<compile_context>
chip_gen: v7x
topology: tpu7x:2x2x1
jax: 0.10.0
libtpu: 0.0.40
codegen_flags: <defaults>
</compile_context>

<pallas_src>
from functools import partial

import numpy as np
import jax
import jax.numpy as jnp
from jax.experimental import pallas as pl
from jax.experimental.pallas import tpu as pltpu


# ----------------------------- Pallas kernel --------------------------------
def _critic_kernel(x_ref, w1_ref, b1_ref, w2_ref, b2_ref, w3_ref, b3_ref, o_ref):
    x = x_ref[...]                                                   # [TB, 6*L]
    h1 = jnp.dot(x, w1_ref[...], preferred_element_type=jnp.float32) + b1_ref[...]
    h1 = jnp.maximum(h1, 0.0)                                        # [TB, Dh]
    h2 = jnp.dot(h1, w2_ref[...], preferred_element_type=jnp.float32) + b2_ref[...]
    h2 = jnp.maximum(h2, 0.0)                                        # [TB, H]
    o_ref[...] = (jnp.dot(h2, w3_ref[...], preferred_element_type=jnp.float32)
                  + b3_ref[...])                                     # [TB, 128]


# ----------------------------- parameter setup ------------------------------
def _xavier_uniform(key, shape, fan_in, fan_out):
    bound = float(np.sqrt(6.0 / (fan_in + fan_out)))
    return jax.random.uniform(key, shape, jnp.float32, -bound, bound)


def make_critic_params(key, n_feature, n_action, n_conv_filter, kernel_size,
                       first_fc_output_dim, hidden_fc_output_dim, out_pad=128):
    """Builds torch-equivalent raw weights and the fused kernel weights."""
    F1, C, K = first_fc_output_dim, n_conv_filter, kernel_size
    H, L = hidden_fc_output_dim, n_feature[1]
    n_ch = n_feature[0]
    lout_h = L - K + 1
    lout_c = n_action - K + 1
    hidden_in = 3 * F1 + 2 * C * lout_h + C * lout_c

    ks = jax.random.split(key, 8)
    # torch-equivalent raw weights (all biases are 0.0 per torch.nn.init.constant_)
    br_w = _xavier_uniform(ks[0], (F1, 1), 1, F1)       # bitrate_fc.weight
    bf_w = _xavier_uniform(ks[1], (F1, 1), 1, F1)       # buffer_size_fc.weight
    cl_w = _xavier_uniform(ks[2], (F1, 1), 1, F1)       # chunk_left_fc.weight
    tp_w = _xavier_uniform(ks[3], (C, K), K, C * K)     # throughput_conv.weight (in=1 squeezed)
    tm_w = _xavier_uniform(ks[4], (C, K), K, C * K)     # time_conv.weight
    cs_w = _xavier_uniform(ks[5], (C, K), K, C * K)     # chunk_size_conv.weight
    hid_w = _xavier_uniform(ks[6], (H, hidden_in), hidden_in, H)
    out_w = _xavier_uniform(ks[7], (1, H), H, 1)

    # ---- fused stage-1 block-diagonal matrix W1 [n_ch*L, hidden_in] ----
    # cat order: [bitrate, buffer, throughput_flat, time_flat, chunk_size_flat, chunk_left]
    W1 = np.zeros((n_ch * L, hidden_in), dtype=np.float32)
    col = 0
    W1[0 * L + (L - 1), col:col + F1] = np.asarray(br_w)[:, 0]; col += F1   # x[:,0,-1]
    W1[1 * L + (L - 1), col:col + F1] = np.asarray(bf_w)[:, 0]; col += F1   # x[:,1,-1]
    for w_np, ch, lout in ((np.asarray(tp_w), 2, lout_h),
                           (np.asarray(tm_w), 3, lout_h),
                           (np.asarray(cs_w), 4, lout_c)):
        for c in range(C):
            for l in range(lout):
                # conv_out[b,c,l] = sum_k x[b,ch,l+k] * w[c,k]
                W1[ch * L + l: ch * L + l + K, col + c * lout + l] = w_np[c]
        col += C * lout
    W1[5 * L + (L - 1), col:col + F1] = np.asarray(cl_w)[:, 0]; col += F1   # x[:,5,-1]
    assert col == hidden_in
    b1 = np.zeros((1, hidden_in), np.float32)            # all stage-1 biases are 0

    w2 = np.asarray(hid_w).T                             # [hidden_in, H]
    b2 = np.zeros((1, H), np.float32)
    w3 = np.zeros((H, out_pad), np.float32)              # lane-dense padded output
    w3[:, 0] = np.asarray(out_w)[0]
    b3 = np.zeros((1, out_pad), np.float32)

    fused = dict(w1=jnp.asarray(W1), b1=jnp.asarray(b1),
                 w2=jnp.asarray(w2), b2=jnp.asarray(b2),
                 w3=jnp.asarray(w3), b3=jnp.asarray(b3))
    raw = dict(br_w=br_w, bf_w=bf_w, cl_w=cl_w, tp_w=tp_w, tm_w=tm_w,
               cs_w=cs_w, hid_w=hid_w, out_w=out_w)
    return dict(fused=fused, raw=raw)


# ------------------------------ wrapper --------------------------------------
def _round_up(n, m):
    return ((n + m - 1) // m) * m


@partial(jax.jit, static_argnames=("batch_tile",))
def _critic_forward_jit(x, w1, b1, w2, b2, w3, b3, *, batch_tile):
    B, n_ch, L = x.shape
    L6 = n_ch * L
    x_flat = x.reshape(B, L6).astype(jnp.float32)

    TB = min(batch_tile, _round_up(B, 8))                # batch tile (multiple of 8)
    Bp = _round_up(B, TB)
    if Bp != B:
        x_flat = jnp.pad(x_flat, ((0, Bp - B), (0, 0)))

    Din, Dh = w1.shape
    H = w2.shape[1]
    OUT_PAD = w3.shape[1]

    out = pl.pallas_call(
        _critic_kernel,
        out_shape=jax.ShapeDtypeStruct((Bp, OUT_PAD), jnp.float32),
        grid_spec=pltpu.PrefetchScalarGridSpec(
            num_scalar_prefetch=0,
            grid=(Bp // TB,),
            in_specs=[
                pl.BlockSpec((TB, L6), lambda i: (i, 0)),       # x: tiled over batch
                pl.BlockSpec((Din, Dh), lambda i: (0, 0)),      # weights: VMEM-resident
                pl.BlockSpec((1, Dh), lambda i: (0, 0)),
                pl.BlockSpec((Dh, H), lambda i: (0, 0)),
                pl.BlockSpec((1, H), lambda i: (0, 0)),
                pl.BlockSpec((H, OUT_PAD), lambda i: (0, 0)),
                pl.BlockSpec((1, OUT_PAD), lambda i: (0, 0)),
            ],
            out_specs=pl.BlockSpec((TB, OUT_PAD), lambda i: (i, 0)),
        ),
        compiler_params=pltpu.CompilerParams(
            dimension_semantics=("parallel",)),
    )(x_flat, w1, b1, w2, b2, w3, b3)

    # column 0 holds the real output; matches torch `.squeeze()` for B > 1
    return out[:B, 0:1].squeeze()


def critic_forward(x, params, *, batch_tile=256):
    f = params["fused"]
    return _critic_forward_jit(x, f["w1"], f["b1"], f["w2"], f["b2"],
                               f["w3"], f["b3"], batch_tile=batch_tile)


# --------------------------- pure-JAX reference ------------------------------
def reference_forward(x, raw, *, n_action):
    def conv1d(sig, w):                                  # sig [B,Lin], w [C,K]
        C, K = w.shape
        lout = sig.shape[1] - K + 1
        cols = jnp.stack([sig[:, l:l + K] for l in range(lout)], axis=1)  # [B,lout,K]
        return jnp.einsum('blk,ck->bcl', cols, w)        # [B,C,lout]

    relu = lambda v: jnp.maximum(v, 0.0)
    br = relu(x[:, 0, -1:] @ raw["br_w"].T)
    bf = relu(x[:, 1, -1:] @ raw["bf_w"].T)
    cl = relu(x[:, 5, -1:] @ raw["cl_w"].T)
    tp = relu(conv1d(x[:, 2, :], raw["tp_w"])).reshape(x.shape[0], -1)
    tm = relu(conv1d(x[:, 3, :], raw["tm_w"])).reshape(x.shape[0], -1)
    cs = relu(conv1d(x[:, 4, :n_action], raw["cs_w"])).reshape(x.shape[0], -1)
    h_in = jnp.concatenate([br, bf, tp, tm, cs, cl], axis=1)
    h = relu(h_in @ raw["hid_w"].T)
    return (h @ raw["out_w"].T).squeeze()


# ------------------------------- main -----------------------------------------
if __name__ == "__main__":
    # config (small, consistent with the module's structure)
    n_feature = (6, 8)            # 6 input "channels", history length 8
    n_action = 6
    n_conv_filter = 16
    kernel_size = 4
    first_fc_output_dim = 16
    hidden_fc_output_dim = 32

    key = jax.random.PRNGKey(0)
    k_param, k_x = jax.random.split(key)
    params = make_critic_params(k_param, n_feature, n_action, n_conv_filter,
                                kernel_size, first_fc_output_dim,
                                hidden_fc_output_dim)

    B = 2
    x = jax.random.normal(k_x, (B, n_feature[0], n_feature[1]), dtype=jnp.float32)

    out = critic_forward(x, params)
    jax.block_until_ready(out)
    assert out.shape == (B,), out.shape

    # structural parity check against a plain-JAX reference of the torch module
    ref = reference_forward(x, params["raw"], n_action=n_action)
    max_err = float(jnp.max(jnp.abs(out - ref)))
    assert max_err < 5e-2, f"parity failure, max_err={max_err}"

    print("KERNEL_OK")
</pallas_src>

<mosaic_0001>
module attributes {stable_mosaic.version = 11 : i64} {
  func.func @_critic_kernel(%arg0: i32, %arg1: memref<8x48xf32, #tpu.memory_space<vmem>>, %arg2: memref<48x256xf32, #tpu.memory_space<vmem>>, %arg3: memref<1x256xf32, #tpu.memory_space<vmem>>, %arg4: memref<256x32xf32, #tpu.memory_space<vmem>>, %arg5: memref<1x32xf32, #tpu.memory_space<vmem>>, %arg6: memref<32x128xf32, #tpu.memory_space<vmem>>, %arg7: memref<1x128xf32, #tpu.memory_space<vmem>>, %arg8: memref<8x128xf32, #tpu.memory_space<vmem>>) attributes {dimension_semantics = [#tpu.dimension_semantics<parallel>], iteration_bounds = array<i64: 1>, scalar_prefetch = 0 : i64, scratch_operands = 0 : i64, tpu.core_type = #tpu.core_type<tc>, window_params = [{transform_indices = @transform_0, window_bounds = array<i64: 8, 48>}, {pipeline_mode = #tpu.pipeline_mode<synchronous>, transform_indices = @transform_1, window_bounds = array<i64: 48, 256>}, {pipeline_mode = #tpu.pipeline_mode<synchronous>, transform_indices = @transform_2, window_bounds = array<i64: 1, 256>}, {pipeline_mode = #tpu.pipeline_mode<synchronous>, transform_indices = @transform_3, window_bounds = array<i64: 256, 32>}, {pipeline_mode = #tpu.pipeline_mode<synchronous>, transform_indices = @transform_4, window_bounds = array<i64: 1, 32>}, {pipeline_mode = #tpu.pipeline_mode<synchronous>, transform_indices = @transform_5, window_bounds = array<i64: 32, 128>}, {pipeline_mode = #tpu.pipeline_mode<synchronous>, transform_indices = @transform_6, window_bounds = array<i64: 1, 128>}, {transform_indices = @transform_7, window_bounds = array<i64: 8, 128>}]} {
    %c0 = arith.constant 0 : index
    %c0_0 = arith.constant 0 : index
    %0 = vector.load %arg1[%c0, %c0_0] : memref<8x48xf32, #tpu.memory_space<vmem>>, vector<8x48xf32>
    %c0_1 = arith.constant 0 : index
    %c0_2 = arith.constant 0 : index
    %1 = vector.load %arg2[%c0_1, %c0_2] : memref<48x256xf32, #tpu.memory_space<vmem>>, vector<48x256xf32>
    %cst = arith.constant dense<0.000000e+00> : vector<8x256xf32>
    %2 = tpu.matmul %0, %1, %cst {dimension_numbers = #tpu.dot_dimension_numbers<[1], [0], [0], [1], [0, 0, 1, 1], [], []>} : vector<8x48xf32>, vector<48x256xf32>, vector<8x256xf32> -> vector<8x256xf32>
    %c0_3 = arith.constant 0 : index
    %c0_4 = arith.constant 0 : index
    %3 = vector.load %arg3[%c0_3, %c0_4] : memref<1x256xf32, #tpu.memory_space<vmem>>, vector<1x256xf32>
    %4 = vector.broadcast %3 : vector<1x256xf32> to vector<8x256xf32>
    %5 = arith.addf %2, %4 : vector<8x256xf32>
    %cst_5 = arith.constant 0.000000e+00 : f32
    %6 = vector.broadcast %cst_5 : f32 to vector<8x256xf32>
    %7 = arith.maximumf %5, %6 : vector<8x256xf32>
    %c0_6 = arith.constant 0 : index
    %c0_7 = arith.constant 0 : index
    %8 = vector.load %arg4[%c0_6, %c0_7] : memref<256x32xf32, #tpu.memory_space<vmem>>, vector<256x32xf32>
    %cst_8 = arith.constant dense<0.000000e+00> : vector<8x32xf32>
    %9 = tpu.matmul %7, %8, %cst_8 {dimension_numbers = #tpu.dot_dimension_numbers<[1], [0], [0], [1], [0, 0, 1, 1], [], []>} : vector<8x256xf32>, vector<256x32xf32>, vector<8x32xf32> -> vector<8x32xf32>
    %c0_9 = arith.constant 0 : index
    %c0_10 = arith.constant 0 : index
    %10 = vector.load %arg5[%c0_9, %c0_10] : memref<1x32xf32, #tpu.memory_space<vmem>>, vector<1x32xf32>
    %11 = vector.broadcast %10 : vector<1x32xf32> to vector<8x32xf32>
    %12 = arith.addf %9, %11 : vector<8x32xf32>
    %cst_11 = arith.constant 0.000000e+00 : f32
    %13 = vector.broadcast %cst_11 : f32 to vector<8x32xf32>
    %14 = arith.maximumf %12, %13 : vector<8x32xf32>
    %c0_12 = arith.constant 0 : index
    %c0_13 = arith.constant 0 : index
    %15 = vector.load %arg6[%c0_12, %c0_13] : memref<32x128xf32, #tpu.memory_space<vmem>>, vector<32x128xf32>
    %cst_14 = arith.constant dense<0.000000e+00> : vector<8x128xf32>
    %16 = tpu.matmul %14, %15, %cst_14 {dimension_numbers = #tpu.dot_dimension_numbers<[1], [0], [0], [1], [0, 0, 1, 1], [], []>} : vector<8x32xf32>, vector<32x128xf32>, vector<8x128xf32> -> vector<8x128xf32>
    %c0_15 = arith.constant 0 : index
    %c0_16 = arith.constant 0 : index
    %17 = vector.load %arg7[%c0_15, %c0_16] : memref<1x128xf32, #tpu.memory_space<vmem>>, vector<1x128xf32>
    %18 = vector.broadcast %17 : vector<1x128xf32> to vector<8x128xf32>
    %19 = arith.addf %16, %18 : vector<8x128xf32>
    %c0_17 = arith.constant 0 : index
    %c0_18 = arith.constant 0 : index
    %20 = vector.load %arg8[%c0_17, %c0_18] : memref<8x128xf32, #tpu.memory_space<vmem>>, vector<8x128xf32>
    tpu.vector_store %arg8[%c0_17, %c0_18], %19 {strides = array<i32>} : memref<8x128xf32, #tpu.memory_space<vmem>>, vector<8x128xf32>,
    return
  }
  func.func @transform_0(%arg0: i32) -> (i32, i32) {
    %c0_i32 = arith.constant 0 : i32
    %c0_i32_0 = arith.constant 0 : i32
    return %arg0, %c0_i32 : i32, i32
  }
  func.func @transform_1(%arg0: i32) -> (i32, i32) {
    %c0_i32 = arith.constant 0 : i32
    %c0_i32_0 = arith.constant 0 : i32
    %c0_i32_1 = arith.constant 0 : i32
    return %c0_i32, %c0_i32_0 : i32, i32
  }
  func.func @transform_2(%arg0: i32) -> (i32, i32) {
    %c0_i32 = arith.constant 0 : i32
    %c0_i32_0 = arith.constant 0 : i32
    %c0_i32_1 = arith.constant 0 : i32
    return %c0_i32, %c0_i32_0 : i32, i32
  }
  func.func @transform_3(%arg0: i32) -> (i32, i32) {
    %c0_i32 = arith.constant 0 : i32
    %c0_i32_0 = arith.constant 0 : i32
    %c0_i32_1 = arith.constant 0 : i32
    return %c0_i32, %c0_i32_0 : i32, i32
  }
  func.func @transform_4(%arg0: i32) -> (i32, i32) {
    %c0_i32 = arith.constant 0 : i32
    %c0_i32_0 = arith.constant 0 : i32
    %c0_i32_1 = arith.constant 0 : i32
    return %c0_i32, %c0_i32_0 : i32, i32
  }
  func.func @transform_5(%arg0: i32) -> (i32, i32) {
    %c0_i32 = arith.constant 0 : i32
    %c0_i32_0 = arith.constant 0 : i32
    %c0_i32_1 = arith.constant 0 : i32
    return %c0_i32, %c0_i32_0 : i32, i32
  }
  func.func @transform_6(%arg0: i32) -> (i32, i32) {
    %c0_i32 = arith.constant 0 : i32
    %c0_i32_0 = arith.constant 0 : i32
    %c0_i32_1 = arith.constant 0 : i32
    return %c0_i32, %c0_i32_0 : i32, i32
  }
  func.func @transform_7(%arg0: i32) -> (i32, i32) {
    %c0_i32 = arith.constant 0 : i32
    %c0_i32_0 = arith.constant 0 : i32
    return %arg0, %c0_i32 : i32, i32
  }
}

</mosaic_0001>

<bundles_post_ra>
// kernel: _critic_forward_jit.1
= control target key start
LH: loop header
LB: loop body
LE: loop exit
PB: predicated region body
PF: predicated region fallthrough
CT: control target
= control target key end

     0   :  { %v436_v3 = vmov 0.0   ;;  %vm51_vm0 = vcmask 392192   ;;  %vm438_vm1 = vmmov 0   ;;  %vm249_vm2 = vcmask 261120   ;;  %s640_s1 = inlined_call_operand.vmem [shape: f32[48,256], index: 1, kind: input, shape index: {}]   ;;  %s641_s3 = inlined_call_operand.vmem [shape: f32[256,32], index: 3, kind: input, shape index: {}]   ;;  %s642_s0 = inlined_call_operand.vmem [shape: f32[8,48], index: 0, kind: input, shape index: {}]   ;;  %s643_s2 = inlined_call_operand.vmem [shape: f32[1,256], index: 2, kind: input, shape index: {}]   ;;  %s644_s5 = inlined_call_operand.vmem [shape: f32[32,128], index: 5, kind: input, shape index: {}]   ;;  %s645_s4 = inlined_call_operand.vmem [shape: f32[1,32], index: 4, kind: input, shape index: {}]   ;;  %s646_s6 = inlined_call_operand.vmem [shape: f32[1,128], index: 6, kind: input, shape index: {}]   ;;  %s647_s7 = inlined_call_operand.vmem [shape: f32[8,128], index: 7, kind: output, shape index: {}]  }
   0x1   :  { %v28_v0 = vld [vmem:[%s640_s1 + $0x8] sm:$0xff]  ;;  %v30_v1 = vld [vmem:[%s640_s1 + $0x18] sm:$0xff]  ;;  %v27_v2 = vld [vmem:[%s640_s1] sm:$0xff]  ;;  %119 = vmatprep.mubr.f32.mxu0 %v436_v3 }
   0x2   :  { %v383_v4 = vpack.c.bf16 %v30_v1, %v28_v0  ;;  %v29_v5 = vld [vmem:[%s640_s1 + $0x10] sm:$0xff]  ;;  %v32_v6 = vld [vmem:[%s640_s1 + $0x28] sm:$0xff]  ;;  %v34_v7 = vld [vmem:[%s640_s1 + $0x38] sm:$0xff] }
   0x3   :  { %v385_v8 = vpack.c.bf16 %v29_v5, %v27_v2  ;;  %v387_v9 = vpack.c.bf16 %v34_v7, %v32_v6  ;;  %v31_v10 = vld [vmem:[%s640_s1 + $0x20] sm:$0xff]  ;;  %v33_v11 = vld [vmem:[%s640_s1 + $0x30] sm:$0xff]  ;;  %v36_v12 = vld [vmem:[%s640_s1 + $0x48] sm:$0xff]  ;;  %v41_v5 = vlaneseq }
   0x4   :  { %384 = vmatprep.subr.bf16.mxu0 %v383_v4  ;;  %v38_v13 = vld [vmem:[%s640_s1 + $0x58] sm:$0xff]  ;;  %v35_v14 = vld [vmem:[%s640_s1 + $0x40] sm:$0xff]  ;;  %v389_v15 = vpack.c.bf16 %v33_v11, %v31_v10  ;;  %v37_v16 = vld [vmem:[%s640_s1 + $0x50] sm:$0xff] }
   0x5   :  { %386 = vmatpush1.bf16.msra.mxu0 %v385_v8  ;;  %v144_v17 = vld [vmem:[%s641_s3 + $0x80] sm:$0xff]  ;;  %v145_v18 = vld [vmem:[%s641_s3 + $0x88] sm:$0xff]  ;;  %v391_v19 = vpack.c.bf16 %v38_v13, %v36_v12  ;;  %v146_v23 = vld [vmem:[%s641_s3 + $0x90] sm:$0xff]  ;;  %v393_v31 = vpack.c.bf16 %v37_v16, %v35_v14  ;;  %v42_v6 = vshrl.u32 %v41_v5, 7 }
   0x6   :  { %388 = vmatprep.subr.bf16.mxu0 %v387_v9  ;;  %v395_v20 = vpack.c.bf16 %v145_v18, %v144_v17  ;;  %v128_v21 = vld [vmem:[%s641_s3] sm:$0xff]  ;;  %v129_v22 = vld [vmem:[%s641_s3 + $0x8] sm:$0xff]  ;;  %v147_v25 = vld [vmem:[%s641_s3 + $0x98] sm:$0xff] }
   0x7   :  { %v397_v24 = vpack.c.bf16 %v129_v22, %v128_v21  ;;  %v130_v26 = vld [vmem:[%s641_s3 + $0x10] sm:$0xff]  ;;  %v131_v27 = vld [vmem:[%s641_s3 + $0x18] sm:$0xff]  ;;  %v399_v28 = vpack.c.bf16 %v147_v25, %v146_v23  ;;  %v148_v29 = vld [vmem:[%s641_s3 + $0xa0] sm:$0xff]  ;;  %v43_v7 = vsub.s32 0, %v42_v6  ;;  %v47_v9 = vsub.s32 1, %v42_v6 }
   0x8   :  { %396 = vmatprep.subr.bf16.mxu1 %v395_v20  ;;  %v149_v30 = vld [vmem:[%s641_s3 + $0xa8] sm:$0xff]  ;;  %v401_v32 = vpack.c.bf16 %v131_v27, %v130_v26  ;;  %v132_v34 = vld [vmem:[%s641_s3 + $0x20] sm:$0xff]  ;;  %v150_v36 = vld [vmem:[%s641_s3 + $0xb0] sm:$0xff]  ;;  %v437_v21 = vmov 0.0|0.0  }
   0x9   :  { %390 = vmatpush1.bf16.msra.mxu0 %v389_v15  ;;  %398 = vmatpush3.bf16.msra.mxu1 %v397_v24  ;;  %v403_v33 = vpack.c.bf16 %v149_v30, %v148_v29  ;;  %v133_v35 = vld [vmem:[%s641_s3 + $0x28] sm:$0xff]  ;;  %v151_v37 = vld [vmem:[%s641_s3 + $0xb8] sm:$0xff]  ;;  %v26_v38 = vld [vmem:[%s642_s0] sm:$0xff] }
   0xa   :  { %392 = vmatprep.subr.bf16.mxu0 %v391_v19  ;;  %400 = vmatprep.subr.bf16.mxu1 %v399_v28  ;;  %v405_v39 = vpack.c.bf16 %v133_v35, %v132_v34  ;;  %v407_v40 = vpack.c.bf16 %v151_v37, %v150_v36  ;;  %v134_v41 = vld [vmem:[%s641_s3 + $0x30] sm:$0xff]  ;;  %v135_v42 = vld [vmem:[%s641_s3 + $0x38] sm:$0xff]  ;;  %v152_v43 = vld [vmem:[%s641_s3 + $0xc0] sm:$0xff] }
   0xb   :  { %v153_v44 = vld [vmem:[%s641_s3 + $0xc8] sm:$0xff]  ;;  %v409_v45 = vpack.c.bf16 %v135_v42, %v134_v41  ;;  %v136_v47 = vld [vmem:[%s641_s3 + $0x40] sm:$0xff]  ;;  %v154_v49 = vld [vmem:[%s641_s3 + $0xd0] sm:$0xff] }
   0xc   :  { %v411_v46 = vpack.c.bf16 %v153_v44, %v152_v43  ;;  %v137_v48 = vld [vmem:[%s641_s3 + $0x48] sm:$0xff]  ;;  %v155_v50 = vld [vmem:[%s641_s3 + $0xd8] sm:$0xff]  ;;  %v138_v53 = vld [vmem:[%s641_s3 + $0x50] sm:$0xff] }
   0xd   :  { %394 = vmatpush1.bf16.msra.mxu0 %v393_v31  ;;  %402 = vmatpush3.bf16.msra.mxu1 %v401_v32  ;;  %v413_v51 = vpack.c.bf16 %v137_v48, %v136_v47  ;;  %v415_v52 = vpack.c.bf16 %v155_v50, %v154_v49  ;;  %v139_v54 = vld [vmem:[%s641_s3 + $0x58] sm:$0xff]  ;;  %v156_v55 = vld [vmem:[%s641_s3 + $0xe0] sm:$0xff]  ;;  %v157_v56 = vld [vmem:[%s641_s3 + $0xe8] sm:$0xff] }
   0xe   :  { %404 = vmatprep.subr.bf16.mxu1 %v403_v33  ;;  %v417_v57 = vpack.c.bf16 %v139_v54, %v138_v53  ;;  %v419_v58 = vpack.c.bf16 %v157_v56, %v156_v55  ;;  %v140_v59 = vld [vmem:[%s641_s3 + $0x60] sm:$0xff]  ;;  %v141_v60 = vld [vmem:[%s641_s3 + $0x68] sm:$0xff]  ;;  %v158_v62 = vld [vmem:[%s641_s3 + $0xf0] sm:$0xff]  ;;  %427 = vmatprep.subr.bf16.mxu0 %v437_v21 }
   0xf   :  { %v421_v61 = vpack.c.bf16 %v141_v60, %v140_v59  ;;  %v159_v63 = vld [vmem:[%s641_s3 + $0xf8] sm:$0xff]  ;;  %v142_v1 = vld [vmem:[%s641_s3 + $0x70] sm:$0xff]  ;;  %v39_v8 = vld [vmem:[%s643_s2] sm:$0x3] }
  0x10   :  { %328 = vmatmul.mubr.msk.f32.vlgmr.msra.gmra.mrb[0].mxu0 %vm51_vm0, %v26_v38  ;;  %v423_v0 = vpack.c.bf16 %v159_v63, %v158_v62  ;;  %v143_v2 = vld [vmem:[%s641_s3 + $0x78] sm:$0xff]  ;;  %v44_v10 = vrot.slane %v39_v8, %v43_v7  ;;  %v48_v11 = vrot.slane %v39_v8, %v47_v9  ;;  %v238_v18 = vld [vmem:[%s644_s5] sm:$0xff]  ;;  %v239_v19 = vld [vmem:[%s644_s5 + $0x8] sm:$0xff] }
  0x11   :  { %406 = vmatpush3.bf16.msra.mxu1 %v405_v39  ;;  %v425_v4 = vpack.c.bf16 %v143_v2, %v142_v1  ;;  %v428_v20 = vpack.c.bf16 %v239_v19, %v238_v18  ;;  %v240_v22 = vld [vmem:[%s644_s5 + $0x10] sm:$0xff]  ;;  %v241_v23 = vld [vmem:[%s644_s5 + $0x18] sm:$0xff]  ;;  %380 = vmatprep.mubr.msk.f32.mxu0 %vm438_vm1, %v436_v3  ;;  %v329_v26 = vld [vmem:[%s645_s4] ss:$0 sm:$0xff] }
  0x12   :  { %408 = vmatprep.subr.bf16.mxu1 %v407_v40  ;;  %v431_v24 = vpack.c.bf16 %v241_v23, %v240_v22  ;;  %v330_v31 = vld [vmem:[%s646_s6] ss:$0 sm:$0xff] }
  0x13   :  { %429 = vmatpush3.bf16.msra.mxu0 %v428_v20 }
  0x14   :  { %430 = vmatprep.subr.bf16.mxu0 %v437_v21 }
  0x15   :  { %410 = vmatpush3.bf16.msra.mxu1 %v409_v45 }
  0x16   :  { %412 = vmatprep.subr.bf16.mxu1 %v411_v46 }
  0x17   :  { %432 = vmatpush3.bf16.msra.mxu0 %v431_v24 }
  0x19   :  { %414 = vmatpush3.bf16.msra.mxu1 %v413_v51 }
  0x1a   :  { %416 = vmatprep.subr.bf16.mxu1 %v415_v52 }
  0x1d   :  { %418 = vmatpush3.bf16.msra.mxu1 %v417_v57 }
  0x1e   :  { %420 = vmatprep.subr.bf16.mxu1 %v419_v58 }
  0x21   :  { %422 = vmatpush3.bf16.msra.mxu1 %v421_v61 }
  0x22   :  { %424 = vmatprep.subr.bf16.mxu1 %v423_v0 }
  0x25   :  { %426 = vmatpush3.bf16.msra.mxu1 %v425_v4 }
  0xe3   :  { %v121_v12 = vpop.f32.mrb[0].mxu0 }
  0xe4   :  { %v122_v13 = vadd.f32 %v121_v12, %v44_v10  ;;  %v123_v14 = vpop.f32.mrb[1].mxu0 }
  0xe5   :  { %v124_v15 = vadd.f32 %v123_v14, %v48_v11 }
  0xe6   :  { %v126_v17 = vmax.f32 %v122_v13, 0.0 }
  0xe7   :  { %v127_v16 = vmax.f32 %v124_v15, 0.0 }
  0xe9   :  { %231 = vmatprep.mubr.f32.mxu1 %v127_v16 }
  0xea   :  { %232 = vmatmul.mubr.f32.vlgmr.msra.gmra.mrb[0].mxu1 %v126_v17 }
 0x1bd   :  { %v364_v25 = vpop.f32.mrb[0].mxu1 }
 0x1be   :  { %v365_v27 = vpop.f32.mrb[1].mxu1 }
 0x1bf   :  { %v366_v28 = vadd.f32 %v365_v27, %v364_v25 }
 0x1c1   :  { %v234_v29 = vadd.f32 %v366_v28, %v329_v26 }
 0x1c3   :  { %v237_v30 = vmax.f32 %v234_v29, 0.0 }
 0x1c5   :  { %381 = vmatmul.mubr.msk.f32.vlgmr.msra.gmra.mrb[2].mxu0 %vm249_vm2, %v237_v30 }
 0x298   :  { %v319_v32 = vpop.f32.mrb[2].mxu0 }
 0x299   :  { %v320_v33 = vadd.f32 %v330_v31, %v319_v32  ;;  %v382_v34 = vpop.f32.mrb[3].mxu0 }
 0x29b   :  { %323 = vst [vmem:[%s647_s7] sm:$0xff] %v320_v33 }

</bundles_post_ra>
